<compile_context>
chip_gen: v6e
topology: v6e:2x2x1
jax: 0.10.0
libtpu: 0.0.40
codegen_flags: <defaults>
</compile_context>

<pallas_src>
import functools

import jax
import jax.numpy as jnp
from jax.experimental import pallas as pl
from jax.experimental.pallas import tpu as pltpu


# ---------------------------------------------------------------------------
# Kernels
# ---------------------------------------------------------------------------
def _maxpool_nomask_kernel(sl, tile_s, x_ref, o_ref, acc_ref):
    k = pl.program_id(1)
    nk = pl.num_programs(1)
    neg_inf = jnp.asarray(-jnp.inf, dtype=acc_ref.dtype)

    @pl.when(k == 0)
    def _init():
        acc_ref[...] = jnp.full(acc_ref.shape, neg_inf, acc_ref.dtype)

    x = x_ref[...]                                              # (BB, TILE_S, hd)
    if sl % tile_s:                                             # ragged seq tail only
        seq_idx = k * tile_s + jax.lax.broadcasted_iota(jnp.int32, (1, tile_s, 1), 1)
        x = jnp.where(seq_idx >= sl, neg_inf, x)
    acc_ref[...] = jnp.maximum(acc_ref[...], jnp.max(x, axis=1))

    @pl.when(k == nk - 1)
    def _finalize():
        o_ref[...] = acc_ref[...].astype(o_ref.dtype)


def _maxpool_lengths_kernel(sl, tile_s, bml_ref, lens_ref, x_ref, o_ref, acc_ref):
    # bml_ref: SMEM (num_batch_blocks,) int32  -- max length inside this batch block
    # lens_ref: VMEM (BB, 1) int32             -- per-row lengths
    b = pl.program_id(0)
    k = pl.program_id(1)
    nk = pl.num_programs(1)
    neg_inf = jnp.asarray(-jnp.inf, dtype=acc_ref.dtype)

    @pl.when(k == 0)
    def _init():
        acc_ref[...] = jnp.full(acc_ref.shape, neg_inf, acc_ref.dtype)

    # Skip compute on seq tiles that are padding for every row in this batch block.
    @pl.when(k * tile_s < bml_ref[b])
    def _compute():
        x = x_ref[...]                                          # (BB, TILE_S, hd)
        lens = lens_ref[...][:, :, None]                        # (BB, 1, 1)
        # lane-narrow iota: broadcasts along hd inside the compare/select
        seq_idx = k * tile_s + jax.lax.broadcasted_iota(jnp.int32, (1, tile_s, 1), 1)
        masked_out = seq_idx >= lens                            # (BB, TILE_S, 1)
        if sl % tile_s:
            masked_out = masked_out | (seq_idx >= sl)
        tile_max = jnp.max(jnp.where(masked_out, neg_inf, x), axis=1)
        acc_ref[...] = jnp.maximum(acc_ref[...], tile_max)

    @pl.when(k == nk - 1)
    def _finalize():
        o_ref[...] = acc_ref[...].astype(o_ref.dtype)


def _maxpool_boolmask_kernel(sl, tile_s, x_ref, mask_ref, o_ref, acc_ref):
    # mask_ref: VMEM (BB, TILE_S, 1) int32, nonzero => masked out
    k = pl.program_id(1)
    nk = pl.num_programs(1)
    neg_inf = jnp.asarray(-jnp.inf, dtype=acc_ref.dtype)

    @pl.when(k == 0)
    def _init():
        acc_ref[...] = jnp.full(acc_ref.shape, neg_inf, acc_ref.dtype)

    x = x_ref[...]                                              # (BB, TILE_S, hd)
    masked_out = mask_ref[...] != 0                             # (BB, TILE_S, 1)
    if sl % tile_s:
        seq_idx = k * tile_s + jax.lax.broadcasted_iota(jnp.int32, (1, tile_s, 1), 1)
        masked_out = masked_out | (seq_idx >= sl)
    tile_max = jnp.max(jnp.where(masked_out, neg_inf, x), axis=1)
    acc_ref[...] = jnp.maximum(acc_ref[...], tile_max)

    @pl.when(k == nk - 1)
    def _finalize():
        o_ref[...] = acc_ref[...].astype(o_ref.dtype)


# ---------------------------------------------------------------------------
# Wrapper
# ---------------------------------------------------------------------------
def _choose_tiles(bs, sl, hd, itemsize):
    # sublane multiple for this dtype (8 for f32, 16 for bf16)
    sub = max(8, 32 // max(1, itemsize))
    bb = bs if bs < sub else sub
    # keep one input block around 4 MiB -> ~8 MiB double-buffered: comfortably under
    # the default scoped VMEM on v5e (16 MiB) and v7x (32 MiB scoped / 64 MiB phys).
    budget = 4 * 1024 * 1024
    rows = budget // max(1, bb * hd * itemsize)
    rows = max(sub, (rows // sub) * sub)
    tile_s = sl if sl <= rows else rows
    return bb, tile_s


def max_pool_layer(inputs, mask_or_lengths=None):
    """
    inputs: (batch, seq_len, hidden) float array
    mask_or_lengths: (batch,) int lengths, or (batch, seq_len) bool mask
                     (True = masked out), or None.
    returns: (batch, hidden)
    """
    bs, sl, hd = inputs.shape
    dtype = inputs.dtype
    itemsize = jnp.dtype(dtype).itemsize
    bb, tile_s = _choose_tiles(bs, sl, hd, itemsize)
    nb = pl.cdiv(bs, bb)
    nk = pl.cdiv(sl, tile_s)

    out_shape = jax.ShapeDtypeStruct((bs, hd), dtype)
    acc_scratch = pltpu.VMEM((bb, hd), dtype)
    cparams = pltpu.CompilerParams(dimension_semantics=("parallel", "arbitrary"))

    x_spec = pl.BlockSpec((bb, tile_s, hd), lambda b, k, *_: (b, k, 0))
    o_spec = pl.BlockSpec((bb, hd), lambda b, k, *_: (b, 0))

    if mask_or_lengths is None:
        kernel = functools.partial(_maxpool_nomask_kernel, sl, tile_s)
        return pl.pallas_call(
            kernel,
            out_shape=out_shape,
            grid_spec=pltpu.PrefetchScalarGridSpec(
                num_scalar_prefetch=0,
                grid=(nb, nk),
                in_specs=[x_spec],
                out_specs=o_spec,
                scratch_shapes=[acc_scratch],
            ),
            compiler_params=cparams,
        )(inputs)

    if mask_or_lengths.ndim == 1:
        lengths = mask_or_lengths.astype(jnp.int32)
        lens_2d = lengths.reshape(bs, 1)
        pad = nb * bb - bs
        lengths_padded = jnp.pad(lengths, (0, pad)) if pad else lengths
        block_max_len = jnp.max(lengths_padded.reshape(nb, bb), axis=1).astype(jnp.int32)

        lens_spec = pl.BlockSpec((bb, 1), lambda b, k, *_: (b, 0))
        kernel = functools.partial(_maxpool_lengths_kernel, sl, tile_s)
        return pl.pallas_call(
            kernel,
            out_shape=out_shape,
            grid_spec=pltpu.PrefetchScalarGridSpec(
                num_scalar_prefetch=1,                 # block_max_len -> SMEM
                grid=(nb, nk),
                in_specs=[lens_spec, x_spec],
                out_specs=o_spec,
                scratch_shapes=[acc_scratch],
            ),
            compiler_params=cparams,
        )(block_max_len, lens_2d, inputs)

    # boolean (batch, seq) mask: applied in-kernel (no extra HBM pass over inputs).
    # int32 mask keeps the block layout on the safe (8,128) tiling for every tile_s.
    mask_i32 = (mask_or_lengths != 0).astype(jnp.int32)[:, :, None]   # (bs, sl, 1)
    m_spec = pl.BlockSpec((bb, tile_s, 1), lambda b, k, *_: (b, k, 0))
    kernel = functools.partial(_maxpool_boolmask_kernel, sl, tile_s)
    return pl.pallas_call(
        kernel,
        out_shape=out_shape,
        grid_spec=pltpu.PrefetchScalarGridSpec(
            num_scalar_prefetch=0,
            grid=(nb, nk),
            in_specs=[x_spec, m_spec],
            out_specs=o_spec,
            scratch_shapes=[acc_scratch],
        ),
        compiler_params=cparams,
    )(inputs, mask_i32)


# ---------------------------------------------------------------------------
# Self-test
# ---------------------------------------------------------------------------
if __name__ == "__main__":
    key = jax.random.PRNGKey(0)
    k1, k2 = jax.random.split(key)
    bs, sl, hd = 2, 8, 32
    x = jax.random.normal(k1, (bs, sl, hd), dtype=jnp.float32)
    lengths = jnp.array([5, 8], dtype=jnp.int32)

    # lengths path
    out = jax.block_until_ready(max_pool_layer(x, lengths))
    seq_idx = jnp.arange(sl)[None, :]
    pref_mask = seq_idx >= lengths[:, None]
    ref = jnp.max(jnp.where(pref_mask[:, :, None], -jnp.inf, x), axis=1)
    assert out.shape == (bs, hd)
    assert jnp.allclose(out, ref), "lengths path mismatch vs reference"

    # boolean-mask path (True = masked out)
    bmask = jax.random.bernoulli(k2, 0.3, (bs, sl))
    bmask = bmask.at[:, 0].set(False)  # keep at least one valid position per row
    out_m = jax.block_until_ready(max_pool_layer(x, bmask))
    ref_m = jnp.max(jnp.where(bmask[:, :, None], -jnp.inf, x), axis=1)
    assert jnp.allclose(out_m, ref_m), "bool-mask path mismatch vs reference"

    # no-mask path
    out_n = jax.block_until_ready(max_pool_layer(x, None))
    assert jnp.allclose(out_n, jnp.max(x, axis=1)), "no-mask path mismatch vs reference"

    print("KERNEL_OK")
</pallas_src>

<mosaic_0001>
module attributes {stable_mosaic.version = 11 : i64} {
  func.func @_maxpool_lengths_kernel(%arg0: i32, %arg1: i32, %arg2: memref<1xi32, #tpu.memory_space<smem>>, %arg3: memref<2x1xi32, #tpu.memory_space<vmem>>, %arg4: memref<2x8x32xf32, #tpu.memory_space<vmem>>, %arg5: memref<2x32xf32, #tpu.memory_space<vmem>>, %arg6: memref<2x32xf32, #tpu.memory_space<vmem>>) attributes {dimension_semantics = [#tpu.dimension_semantics<parallel>, #tpu.dimension_semantics<arbitrary>], iteration_bounds = array<i64: 1, 1>, scalar_prefetch = 1 : i64, scratch_operands = 1 : i64, tpu.core_type = #tpu.core_type<tc>, window_params = [{transform_indices = @transform_0, window_bounds = array<i64: 2, 1>}, {transform_indices = @transform_1, window_bounds = array<i64: 2, 8, 32>}, {transform_indices = @transform_2, window_bounds = array<i64: 2, 32>}]} {
    %c0_i32 = arith.constant 0 : i32
    %0 = arith.cmpi eq, %arg1, %c0_i32 : i32
    %1 = arith.extui %0 : i1 to i32
    %cst = arith.constant 0xFF800000 : f32
    %c0_i32_0 = arith.constant 0 : i32
    %2 = arith.cmpi ne, %1, %c0_i32_0 : i32
    scf.if %2 {
      %12 = vector.broadcast %cst : f32 to vector<2x32xf32>
      %c0 = arith.constant 0 : index
      %c0_5 = arith.constant 0 : index
      %13 = vector.load %arg6[%c0, %c0_5] : memref<2x32xf32, #tpu.memory_space<vmem>>, vector<2x32xf32>
      tpu.vector_store %arg6[%c0, %c0_5], %12 {strides = array<i32>} : memref<2x32xf32, #tpu.memory_space<vmem>>, vector<2x32xf32>,
    } else {
    }
    %c8_i32 = arith.constant 8 : i32
    %3 = arith.muli %arg1, %c8_i32 : i32
    %4 = arith.index_cast %arg0 : i32 to index
    %5 = memref.load %arg2[%4] : memref<1xi32, #tpu.memory_space<smem>>
    %6 = arith.cmpi slt, %3, %5 : i32
    %7 = arith.extui %6 : i1 to i32
    %cst_1 = arith.constant 0xFF800000 : f32
    %c0_i32_2 = arith.constant 0 : i32
    %8 = arith.cmpi ne, %7, %c0_i32_2 : i32
    scf.if %8 {
      %c0 = arith.constant 0 : index
      %c0_5 = arith.constant 0 : index
      %c0_6 = arith.constant 0 : index
      %12 = vector.load %arg4[%c0, %c0_5, %c0_6] : memref<2x8x32xf32, #tpu.memory_space<vmem>>, vector<2x8x32xf32>
      %c0_7 = arith.constant 0 : index
      %c0_8 = arith.constant 0 : index
      %13 = vector.load %arg3[%c0_7, %c0_8] : memref<2x1xi32, #tpu.memory_space<vmem>>, vector<2x1xi32>
      %14 = vector.shape_cast %13 : vector<2x1xi32> to vector<2x1x1xi32>
      %c8_i32_9 = arith.constant 8 : i32
      %15 = arith.muli %arg1, %c8_i32_9 : i32
      %16 = tpu.iota {dimensions = array<i32: 1>} : vector<1x8x1xi32>
      %17 = vector.broadcast %15 : i32 to vector<1x8x1xi32>
      %18 = arith.addi %17, %16 : vector<1x8x1xi32>
      %19 = vector.broadcast %18 : vector<1x8x1xi32> to vector<2x8x1xi32>
      %20 = vector.broadcast %14 : vector<2x1x1xi32> to vector<2x8x1xi32>
      %21 = arith.cmpi sge, %19, %20 : vector<2x8x1xi32>
      %22 = vector.shape_cast %21 : vector<2x8x1xi1> to vector<2x8x1xi1>
      %23 = vector.broadcast %22 : vector<2x8x1xi1> to vector<2x8x32xi1>
      %24 = vector.broadcast %cst_1 : f32 to vector<2x8x32xf32>
      %25 = arith.select %23, %24, %12 : vector<2x8x32xi1>, vector<2x8x32xf32>
      %cst_10 = arith.constant dense<0xFF800000> : vector<2x32xf32>
      %26 = vector.multi_reduction <maximumf>, %25, %cst_10 [1] : vector<2x8x32xf32> to vector<2x32xf32>
      %c0_11 = arith.constant 0 : index
      %c0_12 = arith.constant 0 : index
      %27 = vector.load %arg6[%c0_11, %c0_12] : memref<2x32xf32, #tpu.memory_space<vmem>>, vector<2x32xf32>
      %28 = arith.maximumf %27, %26 : vector<2x32xf32>
      %c0_13 = arith.constant 0 : index
      %c0_14 = arith.constant 0 : index
      %29 = vector.load %arg6[%c0_13, %c0_14] : memref<2x32xf32, #tpu.memory_space<vmem>>, vector<2x32xf32>
      tpu.vector_store %arg6[%c0_13, %c0_14], %28 {strides = array<i32>} : memref<2x32xf32, #tpu.memory_space<vmem>>, vector<2x32xf32>,
    } else {
    }
    %c0_i32_3 = arith.constant 0 : i32
    %9 = arith.cmpi eq, %arg1, %c0_i32_3 : i32
    %10 = arith.extui %9 : i1 to i32
    %c0_i32_4 = arith.constant 0 : i32
    %11 = arith.cmpi ne, %10, %c0_i32_4 : i32
    scf.if %11 {
      %c0 = arith.constant 0 : index
      %c0_5 = arith.constant 0 : index
      %12 = vector.load %arg6[%c0, %c0_5] : memref<2x32xf32, #tpu.memory_space<vmem>>, vector<2x32xf32>
      %c0_6 = arith.constant 0 : index
      %c0_7 = arith.constant 0 : index
      %13 = vector.load %arg5[%c0_6, %c0_7] : memref<2x32xf32, #tpu.memory_space<vmem>>, vector<2x32xf32>
      tpu.vector_store %arg5[%c0_6, %c0_7], %12 {strides = array<i32>} : memref<2x32xf32, #tpu.memory_space<vmem>>, vector<2x32xf32>,
    } else {
    }
    return
  }
  func.func @transform_0(%arg0: i32, %arg1: i32, %arg2: memref<1xi32, #tpu.memory_space<smem>>) -> (i32, i32) {
    %c0_i32 = arith.constant 0 : i32
    %c0_i32_0 = arith.constant 0 : i32
    return %arg0, %c0_i32 : i32, i32
  }
  func.func @transform_1(%arg0: i32, %arg1: i32, %arg2: memref<1xi32, #tpu.memory_space<smem>>) -> (i32, i32, i32) {
    %c0_i32 = arith.constant 0 : i32
    %c0_i32_0 = arith.constant 0 : i32
    return %arg0, %arg1, %c0_i32 : i32, i32, i32
  }
  func.func @transform_2(%arg0: i32, %arg1: i32, %arg2: memref<1xi32, #tpu.memory_space<smem>>) -> (i32, i32) {
    %c0_i32 = arith.constant 0 : i32
    %c0_i32_0 = arith.constant 0 : i32
    return %arg0, %c0_i32 : i32, i32
  }
}

</mosaic_0001>

<bundles_post_ra>
// kernel: tpu_custom_call.1
= control target key start
LH: loop header
LB: loop body
LE: loop exit
PB: predicated region body
PF: predicated region fallthrough
CT: control target
= control target key end

     0   :  { %9 = vsyncpa [#allocation6], 0  ;;  %s233_s0 = inlined_call_operand.<no memory space> [shape: s32[1], index: 0, kind: input, shape index: {}]   ;;  %s234_s1 = inlined_call_operand.vmem [shape: s32[2,1], index: 1, kind: input, shape index: {}]   ;;  %s235_s2 = inlined_call_operand.hbm [shape: f32[2,8,32], index: 2, kind: input, shape index: {}]   ;;  %s236_s3 = inlined_call_operand.hbm [shape: f32[2,32], index: 3, kind: output, shape index: {}]  }
   0x1   :  { %10 = vsyncpa [#allocation7], 0  ;;  %s191_s12 = smov [#allocation5]  }
   0x2   :  { %s18_s13 = sshll.u32 %s191_s12, 4  ;;  %s19_s13 = int_to_ptr.vmem [resolvable:$true] %s18_s13 }
   0x3   :  { %s155_s14 = scalar_lea.vmem %s19_s13, 256  ;;  %p160_p1 = scmp.lt.s32.totalorder %s19_s13, %s19_s13 }
   0x4   :  { %p156_p0 = scmp.ne.s32.totalorder %s19_s13, %s155_s14  ;;  %p161_p2 = scmp.lt.s32.totalorder %s155_s14, %s155_s14 }
   0x6   :  { %p162_p3 = por %p161_p2, %p160_p1 }
   0x8   :  { %p163_p4 = pnand %p162_p3, %p156_p0 }
   0xa   :  { %166 = shalt.err (!%p163_p4)
}
   0xb   :  { %s192_s15 = smov 128   ;;  %s193_s16 = smov 8  }
   0xc   :  { %24 = dma.hbm_to_vmem [thread:$0]  %s235_s2, 256, %s19_s13, [#allocation6], %s192_s15, %s192_s15, %s193_s16  }
   0xd   :  { %187 = dma.done.wait [#allocation6], 256  }
   0xe   :  { %188 = vsyncadd [#allocation6], 4294967040  ;;  %vm32_vm0 = vcmask 254976   ;;  %v194_v0 = vmov -inf   ;;  %p137_p5 = scmp.le.s32.totalorder %s233_s0, 0 }
   0xf   :  { %33 = vst.msk [vmem:[#allocation2] sm:$0x3] %vm32_vm0, %v194_v0 }
  0x10   :  { %39 = sbr.rel (%p137_p5) target bundleno = 181 (0xb5), region = 21 }
  0x15   :  { %v54_v1 = vlaneseq  ;;  %v195_v2 = vmov 0   ;;  %v196_v3 = vmov 1966171168   ;;  %v40_v17 = vld [vmem:[#allocation5] sm:$0xff]  ;;  %vm91_vm3 = vcmask 261120   ;;  %v41_v21 = vld [vmem:[#allocation5 + $0x8] sm:$0xff] }
  0x16   :  { %146 = vset.pattern.permute.xlu0 %v195_v2  ;;  %v52_v4 = vunpack.c.l.s4 %v196_v3  ;;  %v138_v6 = vld.sshfl [vmem:[%s234_s1] sm:$0x11 pattern:$0x75316420]  ;;  %vm109_vm6 = vcmask 1041409  }
  0x17   :  { %v55_v5 = vshrl.u32 %v54_v1, 7  ;;  %v50_v8 = vcombine.high %v138_v6, %v138_v6  ;;  %v106_v36 = vld [vmem:[#allocation2] sm:$0x3] }
  0x18   :  { %v53_v7 = vunpack.c.0.s8 %v52_v4 }
  0x19   :  { %v71_v10 = vsub.s32 0, %v55_v5 }
  0x1a   :  { %v56_v9 = vsub.s32 %v53_v7, %v55_v5 }
  0x1c   :  { %v57_v11 = vrot.slane %v138_v6, %v56_v9  ;;  %v64_v12 = vrot.slane %v50_v8, %v56_v9 }
  0x1e   :  { %v72_v13 = vrot.slane %v57_v11, %v71_v10  ;;  %v76_v14 = vrot.slane %v64_v12, %v71_v10 }
  0x20   :  { %vm77_vm1 = vcmp.ge.s32.totalorder %v55_v5, %v72_v13  ;;  %vm78_vm2 = vcmp.ge.s32.totalorder %v55_v5, %v76_v14 }
  0x21   :  { %v79_v15 = vsel %vm77_vm1, 1, %v195_v2  ;;  %v80_v16 = vsel %vm78_vm2, 1, %v195_v2 }
  0x22   :  { %82 = vperm.xlu0 %146, %v79_v15  }
  0x26   :  { %85 = vperm.xlu0 %146, %v80_v16  }
  0x9d   :  { %v83_v18 = vpop.permute.xlu0 %82 }
  0x9e   :  { %vm87_vm4 = vcmp.eq.s32.totalorder %v83_v18, 1 }
  0x9f   :  { %v89_v19 = vsel %vm87_vm4, -inf, %v40_v17 }
  0xa0   :  { %v92_v20 = vsel %vm91_vm3, %v89_v19, -inf }
  0xa1   :  { %v93_v22 = vrot.slane %v92_v20, 4  ;;  %v86_v23 = vpop.permute.xlu0 %85 }
  0xa2   :  { %vm88_vm5 = vcmp.eq.s32.totalorder %v86_v23, 1 }
  0xa3   :  { %v94_v24 = vmax.f32 %v92_v20, %v93_v22  ;;  %v90_v25 = vsel %vm88_vm5, -inf, %v41_v21 }
  0xa4   :  { %v99_v26 = vsel %vm91_vm3, %v90_v25, -inf }
  0xa5   :  { %v95_v27 = vrot.slane %v94_v24, 2  ;;  %v100_v28 = vrot.slane %v99_v26, 4 }
  0xa7   :  { %v96_v29 = vmax.f32 %v94_v24, %v95_v27  ;;  %v101_v30 = vmax.f32 %v99_v26, %v100_v28 }
  0xa9   :  { %v102_v31 = vrot.slane %v101_v30, 2  ;;  %v97_v32 = vrot.slane %v96_v29, 1 }
  0xab   :  { %v103_v33 = vmax.f32 %v101_v30, %v102_v31  ;;  %v98_v35 = vmax.f32 %v96_v29, %v97_v32 }
  0xad   :  { %v104_v34 = vrot.slane %v103_v33, 1 }
  0xaf   :  { %v105_v37 = vmax.f32 %v103_v33, %v104_v34 }
  0xb1   :  { %v110_v38 = vsel %vm109_vm6, %v105_v37, %v98_v35 }
  0xb2   :  { %v112_v39 = vmax.f32 %v106_v36, %v110_v38 }
  0xb4   :  { %114 = vst.msk [vmem:[#allocation2] sm:$0x3] %vm32_vm0, %v112_v39 }
  0xb5 PF:  { %s197_s0 = smov [#allocation8]  }
  0xb6   :  { %s127_s1 = sshll.u32 %s197_s0, 4  ;;  %s128_s1 = int_to_ptr.vmem [resolvable:$true] %s127_s1 }
  0xb7   :  { %s167_s2 = scalar_lea.vmem %s128_s1, 32  ;;  %p172_p7 = scmp.lt.s32.totalorder %s128_s1, %s128_s1 }
  0xb8   :  { %p168_p6 = scmp.ne.s32.totalorder %s128_s1, %s167_s2  ;;  %p173_p8 = scmp.lt.s32.totalorder %s167_s2, %s167_s2 }
  0xba   :  { %p174_p9 = por %p173_p8, %p172_p7 }
  0xbb   :  { %v118_v40 = vld [vmem:[#allocation2] sm:$0x3] }
  0xbc   :  { %120 = vst.msk [vmem:[#allocation8] sm:$0x3] %vm32_vm0, %v118_v40  ;;  %p175_p10 = pnand %p174_p9, %p168_p6 }
  0xbe   :  { %178 = shalt.err (!%p175_p10)
}
  0xbf   :  { %130 = dma.vmem_to_hbm [thread:$0]  %s128_s1, 32, %s236_s3, [#allocation7]  }
  0xc0   :  { %189 = dma.done.wait [#allocation7], 32  }
  0xc1   :  { %190 = vsyncadd [#allocation7], 4294967264 }
  0xc2   :  { %134 = vsyncpa [#allocation6], 1 }
  0xc3   :  { %135 = vsyncpa [#allocation7], 1 }

</bundles_post_ra>
